<compile_context>
chip_gen: v5e
topology: v5e:2x2
jax: 0.10.0
libtpu: 0.0.40
codegen_flags: <defaults>
</compile_context>

<pallas_src>
import functools

import jax
import jax.numpy as jnp
from jax.experimental import pallas as pl
from jax.experimental.pallas import tpu as pltpu


def _round_up(x, m):
    return ((x + m - 1) // m) * m


_TM_CANDIDATES = (1024, 768, 512, 384, 256, 128, 64, 32, 16)
_TK_CANDIDATES = (1024, 896, 768, 640, 512, 384, 256, 128)
_TN_CANDIDATES = (512, 384, 256, 128)


def _pick_tile(size, candidates, prefer_multi=False):
    """Pick tile size minimizing padded extent; optionally prefer >=2 tiles (megacore)."""
    best_key, best_c = None, None
    for c in candidates:
        pad = _round_up(size, c)
        ntiles = pad // c
        multi_penalty = 1 if (prefer_multi and ntiles < 2) else 0
        key = (pad, multi_penalty, -c)
        if best_key is None or key < best_key:
            best_key, best_c = key, c
    return best_c


def _conv_matmul_relu_kernel(p_ref, w_ref, o_ref, *, tk):
    # p_ref: (tm, tk)    bf16 patches tile (changes every grid step).
    # w_ref: (k_pad, tn) bf16 weight slab, resident across the whole (M, K) sweep.
    # o_ref: (tm, tn)    f32 output tile, resident across the K axis (accumulator).
    kk = pl.program_id(2)

    @pl.when(kk == 0)
    def _():
        o_ref[...] = jnp.zeros_like(o_ref)

    k0 = pl.multiple_of(kk * tk, tk)
    o_ref[...] += jnp.dot(p_ref[...], w_ref[pl.ds(k0, tk), :],
                          preferred_element_type=jnp.float32)

    @pl.when(kk == pl.num_programs(2) - 1)
    def _():
        o_ref[...] = jnp.maximum(o_ref[...], 0.0)


def _im2col_nhwc(x_nhwc, kh, kw, stride, padding):
    """x_nhwc: (N, H, W, C) -> patches (N*Hout*Wout, kh*kw*C), flatten order (i, j, c)."""
    n, h, w, c = x_nhwc.shape
    xp = jnp.pad(x_nhwc, ((0, 0), (padding, padding), (padding, padding), (0, 0)))
    hp, wp = h + 2 * padding, w + 2 * padding
    hout = (hp - kh) // stride + 1
    wout = (wp - kw) // stride + 1
    taps = []
    for i in range(kh):
        for j in range(kw):
            taps.append(
                xp[:, i:i + hout * stride:stride, j:j + wout * stride:stride, :]
            )
    # (N, Hout, Wout, kh*kw, C): channels stay contiguous (lane-friendly rows).
    patches = jnp.stack(taps, axis=3).reshape(n * hout * wout, kh * kw * c)
    return patches, hout, wout


@functools.partial(jax.jit, static_argnames=("stride", "padding"))
def conv2d_nobn_relu(x, weight, *, stride=1, padding=1):
    """Conv2d(bias=False, stride, padding) + ReLU.

    x:      (N, Cin, H, W)      float32 (NCHW, matching PyTorch)
    weight: (Cout, Cin, kh, kw) float32 (PyTorch conv weight layout)
    returns (N, Cout, Hout, Wout) float32
    """
    n, cin, _, _ = x.shape
    cout, cin_w, kh, kw = weight.shape
    assert cin == cin_w

    # bf16 BEFORE im2col: the kh*kw-expanded tensor is written/read at half the bytes.
    x_nhwc = jnp.transpose(x, (0, 2, 3, 1)).astype(jnp.bfloat16)
    patches, hout, wout = _im2col_nhwc(x_nhwc, kh, kw, stride, padding)
    m, k_dim = patches.shape

    # (Cout, Cin, kh, kw) -> (kh, kw, Cin, Cout) -> (K, Cout): matches (i, j, c) order.
    w2d = (jnp.transpose(weight, (2, 3, 1, 0))
           .reshape(kh * kw * cin, cout)
           .astype(jnp.bfloat16))

    # Alignment: bf16 LHS rows want multiples of 16 (sublane packing); lanes 128.
    m16 = _round_up(m, 16)
    k128 = _round_up(k_dim, 128)
    c128 = _round_up(cout, 128)

    tm = _pick_tile(m16, _TM_CANDIDATES, prefer_multi=True)  # >=2 M tiles feeds v7x's 2 TCs
    tk = _pick_tile(k128, _TK_CANDIDATES)
    tn = _pick_tile(c128, _TN_CANDIDATES)

    m_pad = _round_up(m16, tm)
    k_pad = _round_up(k128, tk)
    cout_pad = _round_up(c128, tn)

    # Zero padding is contraction-neutral; padded rows/cols are sliced off afterwards.
    patches = jnp.pad(patches, ((0, m_pad - m), (0, k_pad - k_dim)))
    w2d = jnp.pad(w2d, ((0, k_pad - k_dim), (0, cout_pad - cout)))

    # Cout tiles outermost -> the full-K weight slab stays VMEM-resident for the whole
    # M sweep (DMA'd once per Cout tile). K innermost ("arbitrary") for accumulation.
    grid = (cout_pad // tn, m_pad // tm, k_pad // tk)

    cost = pl.CostEstimate(
        flops=2 * m_pad * k_pad * cout_pad,
        transcendentals=0,
        bytes_accessed=(m_pad * k_pad * 2 * grid[0]   # patches re-read once per Cout tile
                        + k_pad * cout_pad * 2        # weights read once (resident slab)
                        + m_pad * cout_pad * 4),      # f32 output written once
    )

    out2d = pl.pallas_call(
        functools.partial(_conv_matmul_relu_kernel, tk=tk),
        out_shape=jax.ShapeDtypeStruct((m_pad, cout_pad), jnp.float32),
        grid_spec=pltpu.PrefetchScalarGridSpec(
            num_scalar_prefetch=0,
            grid=grid,
            in_specs=[
                pl.BlockSpec((tm, tk), lambda j, i, kk: (i, kk)),
                pl.BlockSpec((k_pad, tn), lambda j, i, kk: (0, j)),
            ],
            out_specs=pl.BlockSpec((tm, tn), lambda j, i, kk: (i, j)),
        ),
        compiler_params=pltpu.CompilerParams(
            dimension_semantics=("parallel", "parallel", "arbitrary"),
            vmem_limit_bytes=40 * 1024 * 1024,  # safe headroom even on v7x's 64 MiB
        ),
        cost_estimate=cost,
    )(patches, w2d)

    out2d = out2d[:m, :cout]
    # (N*Hout*Wout, Cout) -> (N, Cout, Hout, Wout)
    return out2d.reshape(n, hout, wout, cout).transpose(0, 3, 1, 2)


if __name__ == "__main__":
    # Module config (the **kwargs of nn.Conv2d): kernel_size=3, stride=1, padding=1.
    N, CIN, H, W = 2, 4, 16, 16
    COUT, KH, KW = 8, 3, 3
    STRIDE, PAD = 1, 1

    key = jax.random.PRNGKey(0)
    kx, kw_ = jax.random.split(key)
    x = jax.random.normal(kx, (N, CIN, H, W), dtype=jnp.float32)
    # Deterministic weight init (no checkpoint): small normal weights.
    weight = 0.1 * jax.random.normal(kw_, (COUT, CIN, KH, KW), dtype=jnp.float32)

    out = conv2d_nobn_relu(x, weight, stride=STRIDE, padding=PAD)
    out = jax.block_until_ready(out)

    # Reference: same bf16 input rounding as the kernel feeds the MXU (accumulation is
    # f32 in both), conv at highest precision, then ReLU.
    xq = x.astype(jnp.bfloat16).astype(jnp.float32)
    wq = weight.astype(jnp.bfloat16).astype(jnp.float32)
    ref = jax.lax.conv_general_dilated(
        xq, wq,
        window_strides=(STRIDE, STRIDE),
        padding=((PAD, PAD), (PAD, PAD)),
        dimension_numbers=("NCHW", "OIHW", "NCHW"),
        precision=jax.lax.Precision.HIGHEST,
    )
    ref = jnp.maximum(ref, 0.0)
    assert out.shape == ref.shape
    assert jnp.allclose(out, ref, atol=1e-3, rtol=1e-3)

    print("KERNEL_OK")
</pallas_src>

<mosaic_0001>
module attributes {stable_mosaic.version = 11 : i64} {
  func.func @_conv_matmul_relu_kernel(%arg0: i32, %arg1: i32, %arg2: i32, %arg3: memref<256x128xbf16, #tpu.memory_space<vmem>>, %arg4: memref<128x128xbf16, #tpu.memory_space<vmem>>, %arg5: memref<256x128xf32, #tpu.memory_space<vmem>>) attributes {dimension_semantics = [#tpu.dimension_semantics<parallel>, #tpu.dimension_semantics<parallel>, #tpu.dimension_semantics<arbitrary>], iteration_bounds = array<i64: 1, 2, 1>, scalar_prefetch = 0 : i64, scratch_operands = 0 : i64, tpu.core_type = #tpu.core_type<tc>, window_params = [{transform_indices = @transform_0, window_bounds = array<i64: 256, 128>}, {transform_indices = @transform_1, window_bounds = array<i64: 128, 128>}, {transform_indices = @transform_2, window_bounds = array<i64: 256, 128>}]} {
    %c0_i32 = arith.constant 0 : i32
    %0 = arith.cmpi eq, %arg2, %c0_i32 : i32
    %1 = arith.extui %0 : i1 to i32
    %c0_i32_0 = arith.constant 0 : i32
    %2 = arith.cmpi ne, %1, %c0_i32_0 : i32
    scf.if %2 {
      %cst_9 = arith.constant 0.000000e+00 : f32
      %15 = vector.broadcast %cst_9 : f32 to vector<256x128xf32>
      %c0_10 = arith.constant 0 : index
      %c0_11 = arith.constant 0 : index
      %16 = vector.load %arg5[%c0_10, %c0_11] : memref<256x128xf32, #tpu.memory_space<vmem>>, vector<256x128xf32>
      tpu.vector_store %arg5[%c0_10, %c0_11], %15 {strides = array<i32>} : memref<256x128xf32, #tpu.memory_space<vmem>>, vector<256x128xf32>,
    } else {
    }
    %c128_i32 = arith.constant 128 : i32
    %3 = arith.muli %arg2, %c128_i32 : i32
    %4 = tpu.assume_multiple %3, 128 : i32
    %c0 = arith.constant 0 : index
    %c0_1 = arith.constant 0 : index
    %5 = vector.load %arg5[%c0, %c0_1] : memref<256x128xf32, #tpu.memory_space<vmem>>, vector<256x128xf32>
    %c0_2 = arith.constant 0 : index
    %c0_3 = arith.constant 0 : index
    %6 = vector.load %arg3[%c0_2, %c0_3] : memref<256x128xbf16, #tpu.memory_space<vmem>>, vector<256x128xbf16>
    %7 = arith.index_cast %4 : i32 to index
    %c0_4 = arith.constant 0 : index
    %8 = vector.load %arg4[%7, %c0_4] : memref<128x128xbf16, #tpu.memory_space<vmem>>, vector<128x128xbf16>
    %cst = arith.constant dense<0.000000e+00> : vector<256x128xf32>
    %9 = tpu.matmul %6, %8, %cst {dimension_numbers = #tpu.dot_dimension_numbers<[1], [0], [0], [1], [0, 0, 1, 1], [], []>} : vector<256x128xbf16>, vector<128x128xbf16>, vector<256x128xf32> -> vector<256x128xf32>
    %10 = arith.addf %5, %9 : vector<256x128xf32>
    %c0_5 = arith.constant 0 : index
    %c0_6 = arith.constant 0 : index
    %11 = vector.load %arg5[%c0_5, %c0_6] : memref<256x128xf32, #tpu.memory_space<vmem>>, vector<256x128xf32>
    tpu.vector_store %arg5[%c0_5, %c0_6], %10 {strides = array<i32>} : memref<256x128xf32, #tpu.memory_space<vmem>>, vector<256x128xf32>,
    %c0_i32_7 = arith.constant 0 : i32
    %12 = arith.cmpi eq, %arg2, %c0_i32_7 : i32
    %13 = arith.extui %12 : i1 to i32
    %c0_i32_8 = arith.constant 0 : i32
    %14 = arith.cmpi ne, %13, %c0_i32_8 : i32
    scf.if %14 {
      %c0_9 = arith.constant 0 : index
      %c0_10 = arith.constant 0 : index
      %15 = vector.load %arg5[%c0_9, %c0_10] : memref<256x128xf32, #tpu.memory_space<vmem>>, vector<256x128xf32>
      %cst_11 = arith.constant 0.000000e+00 : f32
      %16 = vector.broadcast %cst_11 : f32 to vector<256x128xf32>
      %17 = arith.maximumf %15, %16 : vector<256x128xf32>
      %c0_12 = arith.constant 0 : index
      %c0_13 = arith.constant 0 : index
      %18 = vector.load %arg5[%c0_12, %c0_13] : memref<256x128xf32, #tpu.memory_space<vmem>>, vector<256x128xf32>
      tpu.vector_store %arg5[%c0_12, %c0_13], %17 {strides = array<i32>} : memref<256x128xf32, #tpu.memory_space<vmem>>, vector<256x128xf32>,
    } else {
    }
    return
  }
  func.func @transform_0(%arg0: i32, %arg1: i32, %arg2: i32) -> (i32, i32) {
    %c0_i32 = arith.constant 0 : i32
    return %arg1, %arg2 : i32, i32
  }
  func.func @transform_1(%arg0: i32, %arg1: i32, %arg2: i32) -> (i32, i32) {
    %c0_i32 = arith.constant 0 : i32
    %c0_i32_0 = arith.constant 0 : i32
    return %c0_i32, %arg0 : i32, i32
  }
  func.func @transform_2(%arg0: i32, %arg1: i32, %arg2: i32) -> (i32, i32) {
    %c0_i32 = arith.constant 0 : i32
    return %arg1, %arg0 : i32, i32
  }
}

</mosaic_0001>

<bundles_post_ra>
// kernel: conv2d_nobn_relu.1
= control target key start
LH: loop header
LB: loop body
LE: loop exit
PB: predicated region body
PF: predicated region fallthrough
CT: control target
= control target key end

     0   :  { %s1037_s9 = smov 0   ;;  %s1039_s10 = smov 0   ;;  %s1153_s0 = inlined_call_operand.vmem [shape: bf16[512,128], index: 0, kind: input, shape index: {}]   ;;  %s1154_s1 = inlined_call_operand.vmem [shape: bf16[128,128], index: 1, kind: input, shape index: {}]   ;;  %s1155_s2 = inlined_call_operand.vmem [shape: f32[512,128], index: 2, kind: output, shape index: {}]  }
   0x1   :  { %s1041_s11 = smov 0  }
   0x2 LB: > { %s27_s12 = sadd.s32 1, %s1016_s10  ;;  %p822_p0 = scmp.ge.s32.totalorder %s1020_s11, 1  ;;  %s1020_s11 = sphi %s1041_s11, %s12_s11   ;;  %s1016_s10 = sphi %s1039_s10, %s1157_s10   ;;  %s1012_s9 = sphi %s1037_s9, %s1156_s9  }
   0x3   : > { %p29_p1 = scmp.ge.s32.totalorder %s27_s12, 2  ;;  %p148_p2 = scmp.lt.s32.totalorder %s1020_s11, 3 }
   0x5   : > { %s1159_s12 = smov (%p29_p1, %s27_s12), 0  ;;  %p149_p3 = pnand %p822_p0, %p148_p2 }
   0x6   : > { %s823_s21 = sshll.u32 (!%p149_p3), %s1012_s9, 5 }
   0x7   : > { %152 = sbr.rel (%p149_p3) target bundleno = 237 (0xed), region = 28  ;;  %p181_p4 = scmp.lt.s32.totalorder (!%p149_p3), %s823_s21, 63 }
   0xc   : > { %v948_v0 = vld [vmem:[%s1154_s1 + $0x38] sm:$0xff]  ;;  %v947_v1 = vld [vmem:[%s1154_s1 + $0x30] sm:$0xff]  ;;  %v946_v2 = vld [vmem:[%s1154_s1 + $0x28] sm:$0xff]  ;;  %s1161_s21 = smov (!%p181_p4, %s823_s21), 63 }
   0xd   : > { %467 = vmatpush.bf16.msra.mxu0 %v948_v0  ;;  %949 = vmatpush.bf16.msra.mxu1 %v948_v0  ;;  %v945_v3 = vld [vmem:[%s1154_s1 + $0x20] sm:$0xff]  ;;  %v944_v4 = vld [vmem:[%s1154_s1 + $0x18] sm:$0xff]  ;;  %v943_v5 = vld [vmem:[%s1154_s1 + $0x10] sm:$0xff]  ;;  %s824_s28 = sshll.u32 %s1161_s21, 2  ;;  %s826_s6 = sshll.u32 %s1161_s21, 3 }
   0xe   : > { %950 = vmatpush.bf16.msra.mxu2 %v948_v0  ;;  %951 = vmatpush.bf16.msra.mxu3 %v948_v0  ;;  %v942_v6 = vld [vmem:[%s1154_s1 + $0x8] sm:$0xff]  ;;  %v941_v7 = vld [vmem:[%s1154_s1] sm:$0xff]  ;;  %s1088_s5 = scalar_lea.vmem %s1153_s0, %s824_s28  ;;  %s1110_s9 = scalar_lea.vmem %s1155_s2, %s826_s6 }
   0xf   : > { %v925_v8 = vld [vmem:[%s1088_s5] sm:$0xff]  ;;  %v926_v12 = vld [vmem:[%s1088_s5 + $0x8] sm:$0xff]  ;;  %v927_v16 = vld [vmem:[%s1088_s5 + $0x10] sm:$0xff] }
  0x10   : > { %v929_v9 = vld [vmem:[%s1088_s5 + $0x20] sm:$0xff]  ;;  %v930_v13 = vld [vmem:[%s1088_s5 + $0x28] sm:$0xff]  ;;  %v931_v17 = vld [vmem:[%s1088_s5 + $0x30] sm:$0xff] }
  0x11   : > { %468 = vmatpush.bf16.msra.mxu0 %v947_v1  ;;  %952 = vmatpush.bf16.msra.mxu1 %v947_v1  ;;  %v933_v10 = vld [vmem:[%s1088_s5 + $0x40] sm:$0xff]  ;;  %v934_v14 = vld [vmem:[%s1088_s5 + $0x48] sm:$0xff]  ;;  %v935_v18 = vld [vmem:[%s1088_s5 + $0x50] sm:$0xff] }
  0x12   : > { %953 = vmatpush.bf16.msra.mxu2 %v947_v1  ;;  %954 = vmatpush.bf16.msra.mxu3 %v947_v1  ;;  %v937_v11 = vld [vmem:[%s1088_s5 + $0x60] sm:$0xff]  ;;  %v938_v15 = vld [vmem:[%s1088_s5 + $0x68] sm:$0xff]  ;;  %v939_v19 = vld [vmem:[%s1088_s5 + $0x70] sm:$0xff] }
  0x13   : > { %v928_v20 = vld [vmem:[%s1088_s5 + $0x18] sm:$0xff] }
  0x14   : > { %v932_v21 = vld [vmem:[%s1088_s5 + $0x38] sm:$0xff] }
  0x15   : > { %469 = vmatpush.bf16.msra.mxu0 %v946_v2  ;;  %955 = vmatpush.bf16.msra.mxu1 %v946_v2  ;;  %v936_v22 = vld [vmem:[%s1088_s5 + $0x58] sm:$0xff] }
  0x16   : > { %956 = vmatpush.bf16.msra.mxu2 %v946_v2  ;;  %957 = vmatpush.bf16.msra.mxu3 %v946_v2  ;;  %v940_v23 = vld [vmem:[%s1088_s5 + $0x78] sm:$0xff] }
  0x19   : > { %470 = vmatpush.bf16.msra.mxu0 %v945_v3  ;;  %958 = vmatpush.bf16.msra.mxu1 %v945_v3 }
  0x1a   : > { %959 = vmatpush.bf16.msra.mxu2 %v945_v3  ;;  %960 = vmatpush.bf16.msra.mxu3 %v945_v3 }
  0x1d   : > { %471 = vmatpush.bf16.msra.mxu0 %v944_v4  ;;  %961 = vmatpush.bf16.msra.mxu1 %v944_v4 }
  0x1e   : > { %962 = vmatpush.bf16.msra.mxu2 %v944_v4  ;;  %963 = vmatpush.bf16.msra.mxu3 %v944_v4 }
  0x21   : > { %472 = vmatpush.bf16.msra.mxu0 %v943_v5  ;;  %964 = vmatpush.bf16.msra.mxu1 %v943_v5 }
  0x22   : > { %965 = vmatpush.bf16.msra.mxu2 %v943_v5  ;;  %966 = vmatpush.bf16.msra.mxu3 %v943_v5 }
  0x25   : > { %473 = vmatpush.bf16.msra.mxu0 %v942_v6  ;;  %967 = vmatpush.bf16.msra.mxu1 %v942_v6 }
  0x26   : > { %968 = vmatpush.bf16.msra.mxu2 %v942_v6  ;;  %969 = vmatpush.bf16.msra.mxu3 %v942_v6 }
  0x29   : > { %474 = vmatpush.bf16.msra.mxu0 %v941_v7  ;;  %970 = vmatpush.bf16.msra.mxu1 %v941_v7 }
  0x2a   : > { %971 = vmatpush.bf16.msra.mxu2 %v941_v7  ;;  %972 = vmatpush.bf16.msra.mxu3 %v941_v7 }
  0x2c   : > { %475 = vmatmul.bf16.vlgmr.msra.gmra.mxu0 %v925_v8  ;;  %495 = vmatmul.bf16.vlgmr.msra.gmra.mxu1 %v929_v9 }
  0x2d   : > { %515 = vmatmul.bf16.vlgmr.msra.gmra.mxu2 %v933_v10  ;;  %535 = vmatmul.bf16.vlgmr.msra.gmra.mxu3 %v937_v11 }
  0x3c   : > { %480 = vmatmul.bf16.gmra.mxu0 %v926_v12  ;;  %500 = vmatmul.bf16.gmra.mxu1 %v930_v13 }
  0x3d   : > { %520 = vmatmul.bf16.gmra.mxu2 %v934_v14  ;;  %540 = vmatmul.bf16.gmra.mxu3 %v938_v15 }
  0x4c   : > { %485 = vmatmul.bf16.gmra.mxu0 %v927_v16  ;;  %505 = vmatmul.bf16.gmra.mxu1 %v931_v17 }
  0x4d   : > { %525 = vmatmul.bf16.gmra.mxu2 %v935_v18  ;;  %545 = vmatmul.bf16.gmra.mxu3 %v939_v19 }
  0x5c   : > { %490 = vmatmul.bf16.gmra.mxu0 %v928_v20  ;;  %510 = vmatmul.bf16.gmra.mxu1 %v932_v21 }
  0x5d   : > { %530 = vmatmul.bf16.gmra.mxu2 %v936_v22  ;;  %550 = vmatmul.bf16.gmra.mxu3 %v940_v23 }
  0xa9   : > { %v476_v24 = vpop.f32.mrf.mxu0  ;;  %v496_v25 = vpop.f32.mrf.mxu1 }
  0xaa   : > { %v655_v26 = vmax.f32 %v476_v24, 0.0  ;;  %v663_v27 = vmax.f32 %v496_v25, 0.0 }
  0xac   : > { %687 = vst [vmem:[%s1110_s9] sm:$0xff] %v655_v26 }
  0xad   : > { %695 = vst [vmem:[%s1110_s9 + $0x40] sm:$0xff] %v663_v27 }
  0xb0   : > { %v516_v28 = vpop.f32.mrf.mxu2  ;;  %v536_v29 = vpop.f32.mrf.mxu3 }
  0xb1   : > { %v478_v30 = vpop.f32.mrf.mxu0  ;;  %v498_v31 = vpop.f32.mrf.mxu1  ;;  %v671_v32 = vmax.f32 %v516_v28, 0.0  ;;  %v679_v33 = vmax.f32 %v536_v29, 0.0 }
  0xb2   : > { %v656_v34 = vmax.f32 %v478_v30, 0.0  ;;  %v664_v35 = vmax.f32 %v498_v31, 0.0 }
  0xb3   : > { %703 = vst [vmem:[%s1110_s9 + $0x80] sm:$0xff] %v671_v32 }
  0xb4   : > { %711 = vst [vmem:[%s1110_s9 + $0xc0] sm:$0xff] %v679_v33 }
  0xb5   : > { %688 = vst [vmem:[%s1110_s9 + $0x8] sm:$0xff] %v656_v34 }
  0xb6   : > { %696 = vst [vmem:[%s1110_s9 + $0x48] sm:$0xff] %v664_v35 }
  0xb8   : > { %v518_v36 = vpop.f32.mrf.mxu2  ;;  %v538_v37 = vpop.f32.mrf.mxu3 }
  0xb9   : > { %v481_v38 = vpop.f32.mrf.mxu0  ;;  %v501_v39 = vpop.f32.mrf.mxu1  ;;  %v672_v40 = vmax.f32 %v518_v36, 0.0  ;;  %v680_v41 = vmax.f32 %v538_v37, 0.0 }
  0xba   : > { %v657_v42 = vmax.f32 %v481_v38, 0.0  ;;  %v665_v43 = vmax.f32 %v501_v39, 0.0 }
  0xbb   : > { %704 = vst [vmem:[%s1110_s9 + $0x88] sm:$0xff] %v672_v40 }
  0xbc   : > { %712 = vst [vmem:[%s1110_s9 + $0xc8] sm:$0xff] %v680_v41 }
  0xbd   : > { %689 = vst [vmem:[%s1110_s9 + $0x10] sm:$0xff] %v657_v42 }
  0xbe   : > { %697 = vst [vmem:[%s1110_s9 + $0x50] sm:$0xff] %v665_v43 }
  0xc0   : > { %v521_v44 = vpop.f32.mrf.mxu2  ;;  %v541_v45 = vpop.f32.mrf.mxu3 }
  0xc1   : > { %v483_v46 = vpop.f32.mrf.mxu0  ;;  %v503_v47 = vpop.f32.mrf.mxu1  ;;  %v673_v48 = vmax.f32 %v521_v44, 0.0  ;;  %v681_v49 = vmax.f32 %v541_v45, 0.0 }
  0xc2   : > { %v658_v50 = vmax.f32 %v483_v46, 0.0  ;;  %v666_v51 = vmax.f32 %v503_v47, 0.0 }
  0xc3   : > { %705 = vst [vmem:[%s1110_s9 + $0x90] sm:$0xff] %v673_v48 }
  0xc4   : > { %713 = vst [vmem:[%s1110_s9 + $0xd0] sm:$0xff] %v681_v49 }
  0xc5   : > { %690 = vst [vmem:[%s1110_s9 + $0x18] sm:$0xff] %v658_v50 }
  0xc6   : > { %698 = vst [vmem:[%s1110_s9 + $0x58] sm:$0xff] %v666_v51 }
  0xc8   : > { %v523_v52 = vpop.f32.mrf.mxu2  ;;  %v543_v53 = vpop.f32.mrf.mxu3 }
  0xc9   : > { %v486_v54 = vpop.f32.mrf.mxu0  ;;  %v506_v55 = vpop.f32.mrf.mxu1  ;;  %v674_v56 = vmax.f32 %v523_v52, 0.0  ;;  %v682_v57 = vmax.f32 %v543_v53, 0.0 }
  0xca   : > { %v659_v58 = vmax.f32 %v486_v54, 0.0  ;;  %v667_v59 = vmax.f32 %v506_v55, 0.0 }
  0xcb   : > { %706 = vst [vmem:[%s1110_s9 + $0x98] sm:$0xff] %v674_v56 }
  0xcc   : > { %714 = vst [vmem:[%s1110_s9 + $0xd8] sm:$0xff] %v682_v57 }
  0xcd   : > { %691 = vst [vmem:[%s1110_s9 + $0x20] sm:$0xff] %v659_v58 }
  0xce   : > { %699 = vst [vmem:[%s1110_s9 + $0x60] sm:$0xff] %v667_v59 }
  0xd0   : > { %v526_v60 = vpop.f32.mrf.mxu2  ;;  %v546_v61 = vpop.f32.mrf.mxu3 }
  0xd1   : > { %v488_v62 = vpop.f32.mrf.mxu0  ;;  %v508_v63 = vpop.f32.mrf.mxu1  ;;  %v675_v0 = vmax.f32 %v526_v60, 0.0  ;;  %v683_v1 = vmax.f32 %v546_v61, 0.0 }
  0xd2   : > { %v660_v2 = vmax.f32 %v488_v62, 0.0  ;;  %v668_v3 = vmax.f32 %v508_v63, 0.0 }
  0xd3   : > { %707 = vst [vmem:[%s1110_s9 + $0xa0] sm:$0xff] %v675_v0 }
  0xd4   : > { %715 = vst [vmem:[%s1110_s9 + $0xe0] sm:$0xff] %v683_v1 }
  0xd5   : > { %692 = vst [vmem:[%s1110_s9 + $0x28] sm:$0xff] %v660_v2 }
  0xd6   : > { %700 = vst [vmem:[%s1110_s9 + $0x68] sm:$0xff] %v668_v3 }
  0xd8   : > { %v528_v4 = vpop.f32.mrf.mxu2  ;;  %v548_v5 = vpop.f32.mrf.mxu3 }
  0xd9   : > { %v491_v6 = vpop.f32.mrf.mxu0  ;;  %v511_v7 = vpop.f32.mrf.mxu1  ;;  %v676_v8 = vmax.f32 %v528_v4, 0.0  ;;  %v684_v9 = vmax.f32 %v548_v5, 0.0 }
  0xda   : > { %v661_v10 = vmax.f32 %v491_v6, 0.0  ;;  %v669_v11 = vmax.f32 %v511_v7, 0.0 }
  0xdb   : > { %708 = vst [vmem:[%s1110_s9 + $0xa8] sm:$0xff] %v676_v8 }
  0xdc   : > { %716 = vst [vmem:[%s1110_s9 + $0xe8] sm:$0xff] %v684_v9 }
  0xdd   : > { %693 = vst [vmem:[%s1110_s9 + $0x30] sm:$0xff] %v661_v10 }
  0xde   : > { %701 = vst [vmem:[%s1110_s9 + $0x70] sm:$0xff] %v669_v11 }
  0xe0   : > { %v531_v12 = vpop.f32.mrf.mxu2  ;;  %v551_v13 = vpop.f32.mrf.mxu3 }
  0xe1   : > { %v493_v14 = vpop.f32.mrf.mxu0  ;;  %v513_v15 = vpop.f32.mrf.mxu1  ;;  %v677_v16 = vmax.f32 %v531_v12, 0.0  ;;  %v685_v17 = vmax.f32 %v551_v13, 0.0 }
  0xe2   : > { %v662_v18 = vmax.f32 %v493_v14, 0.0  ;;  %v670_v19 = vmax.f32 %v513_v15, 0.0 }
  0xe3   : > { %709 = vst [vmem:[%s1110_s9 + $0xb0] sm:$0xff] %v677_v16 }
  0xe4   : > { %717 = vst [vmem:[%s1110_s9 + $0xf0] sm:$0xff] %v685_v17 }
  0xe5   : > { %694 = vst [vmem:[%s1110_s9 + $0x38] sm:$0xff] %v662_v18 }
  0xe6   : > { %702 = vst [vmem:[%s1110_s9 + $0x78] sm:$0xff] %v670_v19 }
  0xe8   : > { %v533_v20 = vpop.f32.mrf.mxu2  ;;  %v553_v21 = vpop.f32.mrf.mxu3 }
  0xe9   : > { %v678_v22 = vmax.f32 %v533_v20, 0.0  ;;  %v686_v23 = vmax.f32 %v553_v21, 0.0 }
  0xeb   : > { %710 = vst [vmem:[%s1110_s9 + $0xb8] sm:$0xff] %v678_v22 }
  0xec   : > { %718 = vst [vmem:[%s1110_s9 + $0xf8] sm:$0xff] %v686_v23 }
  0xed PF: > { %s12_s11 = sadd.s32 1, %s1020_s11   ;;  %s1156_s9 = smov %s1016_s10 }
  0xee   : > { %p9_p5 = scmp.ge.s32.totalorder %s12_s11, 4   ;;  %s1157_s10 = smov %s1159_s12 }
  0xf0   :  { %11 = sbr.rel (!%p9_p5) target bundleno = 2 (0x2), region = 70 }

</bundles_post_ra>
